<compile_context>
chip_gen: v7x
topology: tpu7x:2x2x1
jax: 0.10.0
libtpu: 0.0.40
codegen_flags: <defaults>
</compile_context>

<pallas_src>
import jax
import jax.numpy as jnp
from jax.experimental import pallas as pl
from jax.experimental.pallas import tpu as pltpu

HIDDEN = 128   # fixed by the module (nn.Linear(*input_dims, 128))


def _round_up(x, m):
    return (x + m - 1) // m * m


def _dqn_mlp_kernel(x_ref, w1_ref, b1_ref, w2_ref, b2_ref, o_ref):
    # fc1: (TB, D) @ (D, H) -> f32 accumulate on the MXU.
    h = jnp.dot(x_ref[...], w1_ref[...], preferred_element_type=jnp.float32)
    # Bias add + ReLU in f32 on the VPU (rides under the MXU work).
    h = jnp.maximum(h + b1_ref[...], 0.0)
    # fc2: (TB, H) @ (H, A) -> narrow (TB, A) output, f32 accumulate.
    out = jnp.dot(h.astype(w2_ref.dtype), w2_ref[...],
                  preferred_element_type=jnp.float32)
    o_ref[...] = (out + b2_ref[...]).astype(o_ref.dtype)


def prepare_params(w1, b1, w2, b2, *, use_bf16=False):
    """One-time cast of parameters to their kernel dtypes (hoisted off hot path).

    w1: (D, H), b1: (1, H), w2: (H, A), b2: (1, A) -- all float32 in.
    Matmul operands optionally bf16; biases stay f32 (elementwise path is f32).
    """
    compute_dtype = jnp.bfloat16 if use_bf16 else jnp.float32
    return (w1.astype(compute_dtype),
            b1.astype(jnp.float32),
            w2.astype(compute_dtype),
            b2.astype(jnp.float32))


def linear_deep_q_forward(state, params, *, tb=4096, min_steps=2):
    """Fused forward: relu(state @ w1 + b1) @ w2 + b2.

    state:  (B, D) f32
    params: output of prepare_params (w1 (D,H), b1 (1,H), w2 (H,A), b2 (1,A))
    returns (B, A) f32
    """
    w1, b1, w2, b2 = params
    B, D = state.shape
    H = w1.shape[1]
    A = w2.shape[1]
    assert H == HIDDEN and w2.shape[0] == H and b1.shape == (1, H) and b2.shape == (1, A)

    # --- balanced batch tiling (ragged tails pad only a few rows) ---
    # min_steps=2 lets the "parallel" axis use both v7x TensorCores whenever the
    # batch has at least two 8-row sublane groups; harmless on v5e/v6e.
    n_steps = max(pl.cdiv(B, tb), min(min_steps, pl.cdiv(B, 8)))
    TB = _round_up(pl.cdiv(B, n_steps), 8)
    Bp = _round_up(B, TB)

    x = state.astype(w1.dtype)
    if Bp != B:
        x = jnp.pad(x, ((0, Bp - B), (0, 0)))   # zero rows; sliced off below

    grid = (Bp // TB,)
    cost = pl.CostEstimate(
        flops=2 * Bp * (D * H + H * A),
        transcendentals=0,
        bytes_accessed=(Bp * D * x.dtype.itemsize
                        + D * H * w1.dtype.itemsize + H * b1.dtype.itemsize
                        + H * A * w2.dtype.itemsize + A * b2.dtype.itemsize
                        + Bp * A * 4),
    )

    out = pl.pallas_call(
        _dqn_mlp_kernel,
        out_shape=jax.ShapeDtypeStruct((Bp, A), jnp.float32),
        grid=grid,
        in_specs=[
            pl.BlockSpec((TB, D), lambda i: (i, 0)),   # x: streamed over batch
            pl.BlockSpec((D, H), lambda i: (0, 0)),    # w1: VMEM-resident
            pl.BlockSpec((1, H), lambda i: (0, 0)),    # b1: VMEM-resident
            pl.BlockSpec((H, A), lambda i: (0, 0)),    # w2: VMEM-resident
            pl.BlockSpec((1, A), lambda i: (0, 0)),    # b2: VMEM-resident
        ],
        out_specs=pl.BlockSpec((TB, A), lambda i: (i, 0)),   # narrow output
        compiler_params=pltpu.CompilerParams(
            dimension_semantics=("parallel",),          # shards across v7x's 2 TCs
        ),
        cost_estimate=cost,
    )(x, w1, b1, w2, b2)

    return out if Bp == B else out[:B]


def init_params(key, input_dim, hidden, n_actions):
    """Deterministic init mimicking PyTorch nn.Linear (uniform +/- 1/sqrt(fan_in))."""
    k1, k2, k3, k4 = jax.random.split(key, 4)
    bound1 = 1.0 / jnp.sqrt(jnp.float32(input_dim))
    bound2 = 1.0 / jnp.sqrt(jnp.float32(hidden))
    w1 = jax.random.uniform(k1, (input_dim, hidden), jnp.float32, -bound1, bound1)
    b1 = jax.random.uniform(k2, (1, hidden), jnp.float32, -bound1, bound1)
    w2 = jax.random.uniform(k3, (hidden, n_actions), jnp.float32, -bound2, bound2)
    b2 = jax.random.uniform(k4, (1, n_actions), jnp.float32, -bound2, bound2)
    return w1, b1, w2, b2


if __name__ == "__main__":
    # Shapes consistent with the module: input_dims=(8,), n_actions=4, hidden=128
    # (fixed by the module). Primary check at batch=8; secondary at a ragged
    # batch=40 to exercise the multi-step grid + tail padding.
    # TODO(synk): optimizer / MSELoss / training step are not part of the forward
    # pass and are not translated.
    INPUT_DIM, N_ACTIONS = 8, 4

    key = jax.random.PRNGKey(0)
    k_state, k_state2, k_params = jax.random.split(key, 3)

    w1, b1, w2, b2 = init_params(k_params, INPUT_DIM, HIDDEN, N_ACTIONS)

    def ref_forward(s):
        return jnp.maximum(s @ w1 + b1, 0.0) @ w2 + b2

    # --- f32 path, tight tolerance ---
    params_f32 = prepare_params(w1, b1, w2, b2, use_bf16=False)
    state = jax.random.normal(k_state, (8, INPUT_DIM), jnp.float32)
    actions = jax.block_until_ready(linear_deep_q_forward(state, params_f32))
    assert actions.shape == (8, N_ACTIONS)
    assert jnp.allclose(actions, ref_forward(state), atol=1e-5, rtol=1e-5)

    # --- ragged batch (grid > 1, balanced tiles) ---
    state2 = jax.random.normal(k_state2, (40, INPUT_DIM), jnp.float32)
    actions2 = jax.block_until_ready(linear_deep_q_forward(state2, params_f32))
    assert actions2.shape == (40, N_ACTIONS)
    assert jnp.allclose(actions2, ref_forward(state2), atol=1e-5, rtol=1e-5)

    # --- bf16 operand path (production default on v6e/v7x), relaxed tolerance ---
    params_bf16 = prepare_params(w1, b1, w2, b2, use_bf16=True)
    actions_bf = jax.block_until_ready(linear_deep_q_forward(state, params_bf16))
    assert actions_bf.shape == (8, N_ACTIONS)
    assert jnp.allclose(actions_bf, ref_forward(state), atol=3e-2, rtol=3e-2)

    print("KERNEL_OK")
</pallas_src>

<mosaic_0001>
module attributes {stable_mosaic.version = 11 : i64} {
  func.func @_dqn_mlp_kernel(%arg0: i32, %arg1: memref<8x8xf32, #tpu.memory_space<vmem>>, %arg2: memref<8x128xf32, #tpu.memory_space<vmem>>, %arg3: memref<1x128xf32, #tpu.memory_space<vmem>>, %arg4: memref<128x4xf32, #tpu.memory_space<vmem>>, %arg5: memref<1x4xf32, #tpu.memory_space<vmem>>, %arg6: memref<8x4xf32, #tpu.memory_space<vmem>>) attributes {dimension_semantics = [#tpu.dimension_semantics<parallel>], iteration_bounds = array<i64: 1>, scalar_prefetch = 0 : i64, scratch_operands = 0 : i64, tpu.core_type = #tpu.core_type<tc>, window_params = [{transform_indices = @transform_0, window_bounds = array<i64: 8, 8>}, {pipeline_mode = #tpu.pipeline_mode<synchronous>, transform_indices = @transform_1, window_bounds = array<i64: 8, 128>}, {pipeline_mode = #tpu.pipeline_mode<synchronous>, transform_indices = @transform_2, window_bounds = array<i64: 1, 128>}, {pipeline_mode = #tpu.pipeline_mode<synchronous>, transform_indices = @transform_3, window_bounds = array<i64: 128, 4>}, {pipeline_mode = #tpu.pipeline_mode<synchronous>, transform_indices = @transform_4, window_bounds = array<i64: 1, 4>}, {transform_indices = @transform_5, window_bounds = array<i64: 8, 4>}]} {
    %c0 = arith.constant 0 : index
    %c0_0 = arith.constant 0 : index
    %0 = vector.load %arg1[%c0, %c0_0] : memref<8x8xf32, #tpu.memory_space<vmem>>, vector<8x8xf32>
    %c0_1 = arith.constant 0 : index
    %c0_2 = arith.constant 0 : index
    %1 = vector.load %arg2[%c0_1, %c0_2] : memref<8x128xf32, #tpu.memory_space<vmem>>, vector<8x128xf32>
    %cst = arith.constant dense<0.000000e+00> : vector<8x128xf32>
    %2 = tpu.matmul %0, %1, %cst {dimension_numbers = #tpu.dot_dimension_numbers<[1], [0], [0], [1], [0, 0, 1, 1], [], []>} : vector<8x8xf32>, vector<8x128xf32>, vector<8x128xf32> -> vector<8x128xf32>
    %c0_3 = arith.constant 0 : index
    %c0_4 = arith.constant 0 : index
    %3 = vector.load %arg3[%c0_3, %c0_4] : memref<1x128xf32, #tpu.memory_space<vmem>>, vector<1x128xf32>
    %4 = vector.broadcast %3 : vector<1x128xf32> to vector<8x128xf32>
    %5 = arith.addf %2, %4 : vector<8x128xf32>
    %cst_5 = arith.constant 0.000000e+00 : f32
    %6 = vector.broadcast %cst_5 : f32 to vector<8x128xf32>
    %7 = arith.maximumf %5, %6 : vector<8x128xf32>
    %c0_6 = arith.constant 0 : index
    %c0_7 = arith.constant 0 : index
    %8 = vector.load %arg4[%c0_6, %c0_7] : memref<128x4xf32, #tpu.memory_space<vmem>>, vector<128x4xf32>
    %cst_8 = arith.constant dense<0.000000e+00> : vector<8x4xf32>
    %9 = tpu.matmul %7, %8, %cst_8 {dimension_numbers = #tpu.dot_dimension_numbers<[1], [0], [0], [1], [0, 0, 1, 1], [], []>} : vector<8x128xf32>, vector<128x4xf32>, vector<8x4xf32> -> vector<8x4xf32>
    %c0_9 = arith.constant 0 : index
    %c0_10 = arith.constant 0 : index
    %10 = vector.load %arg5[%c0_9, %c0_10] : memref<1x4xf32, #tpu.memory_space<vmem>>, vector<1x4xf32>
    %11 = vector.broadcast %10 : vector<1x4xf32> to vector<8x4xf32>
    %12 = arith.addf %9, %11 : vector<8x4xf32>
    %c0_11 = arith.constant 0 : index
    %c0_12 = arith.constant 0 : index
    %13 = vector.load %arg6[%c0_11, %c0_12] : memref<8x4xf32, #tpu.memory_space<vmem>>, vector<8x4xf32>
    tpu.vector_store %arg6[%c0_11, %c0_12], %12 {strides = array<i32>} : memref<8x4xf32, #tpu.memory_space<vmem>>, vector<8x4xf32>,
    return
  }
  func.func @transform_0(%arg0: i32) -> (i32, i32) {
    %c0_i32 = arith.constant 0 : i32
    %c0_i32_0 = arith.constant 0 : i32
    return %arg0, %c0_i32 : i32, i32
  }
  func.func @transform_1(%arg0: i32) -> (i32, i32) {
    %c0_i32 = arith.constant 0 : i32
    %c0_i32_0 = arith.constant 0 : i32
    %c0_i32_1 = arith.constant 0 : i32
    return %c0_i32, %c0_i32_0 : i32, i32
  }
  func.func @transform_2(%arg0: i32) -> (i32, i32) {
    %c0_i32 = arith.constant 0 : i32
    %c0_i32_0 = arith.constant 0 : i32
    %c0_i32_1 = arith.constant 0 : i32
    return %c0_i32, %c0_i32_0 : i32, i32
  }
  func.func @transform_3(%arg0: i32) -> (i32, i32) {
    %c0_i32 = arith.constant 0 : i32
    %c0_i32_0 = arith.constant 0 : i32
    %c0_i32_1 = arith.constant 0 : i32
    return %c0_i32, %c0_i32_0 : i32, i32
  }
  func.func @transform_4(%arg0: i32) -> (i32, i32) {
    %c0_i32 = arith.constant 0 : i32
    %c0_i32_0 = arith.constant 0 : i32
    %c0_i32_1 = arith.constant 0 : i32
    return %c0_i32, %c0_i32_0 : i32, i32
  }
  func.func @transform_5(%arg0: i32) -> (i32, i32) {
    %c0_i32 = arith.constant 0 : i32
    %c0_i32_0 = arith.constant 0 : i32
    return %arg0, %c0_i32 : i32, i32
  }
}

</mosaic_0001>

<bundles_post_ra>
// kernel: tpu_custom_call.1
= control target key start
LH: loop header
LB: loop body
LE: loop exit
PB: predicated region body
PF: predicated region fallthrough
CT: control target
= control target key end

     0   :  { %vm29_vm0 = vcmask 64512   ;;  %v292_v0 = vmov 0.0   ;;  %vm293_vm1 = vmmov 0   ;;  %v294_v4 = vmov 0.0|0.0   ;;  %s388_s1 = inlined_call_operand.vmem [shape: f32[8,128], index: 1, kind: input, shape index: {}]   ;;  %s389_s0 = inlined_call_operand.vmem [shape: f32[8,8], index: 0, kind: input, shape index: {}]   ;;  %s390_s3 = inlined_call_operand.vmem [shape: f32[128,4], index: 3, kind: input, shape index: {}]   ;;  %s391_s2 = inlined_call_operand.vmem [shape: f32[1,128], index: 2, kind: input, shape index: {}]   ;;  %s392_s4 = inlined_call_operand.vmem [shape: f32[1,4], index: 4, kind: input, shape index: {}]   ;;  %s393_s5 = inlined_call_operand.vmem [shape: f32[8,4], index: 5, kind: output, shape index: {}]  }
   0x1   :  { %225 = vmatprep.subr.mxu0 %v292_v0  ;;  %v21_v1 = vld [vmem:[%s388_s1] sm:$0xff]  ;;  %227 = vmatprep.mubr.msk.f32.mxu0 %vm293_vm1, %v292_v0  ;;  %v105_v5 = vld [vmem:[%s390_s3 + $0x8] sm:$0xff]  ;;  %v106_v6 = vld [vmem:[%s390_s3 + $0x10] sm:$0xff]  ;;  %vm197_vm2 = vcmask 31744  }
   0x2   :  { %v20_v2 = vld [vmem:[%s389_s0] sm:$0xff]  ;;  %226 = vmatpush3.msra.mxu0 %v21_v1  ;;  %265 = vmatprep.subr.bf16.mxu1 %v294_v4  ;;  %v107_v7 = vld [vmem:[%s390_s3 + $0x18] sm:$0xff]  ;;  %v109_v11 = vld [vmem:[%s390_s3 + $0x28] sm:$0xff] }
   0x3   :  { %v104_v3 = vld [vmem:[%s390_s3] sm:$0xff]  ;;  %228 = vmatmul.mubr.msk.f32.vlgmr.msra.gmra.mrb[0].mxu0 %vm29_vm0, %v20_v2  ;;  %262 = vmatprep.mubr.msk.f32.mxu1 %vm293_vm1, %v292_v0  ;;  %v269_v9 = vpack.c.bf16 %v107_v7, %v106_v6  ;;  %v110_v13 = vld [vmem:[%s390_s3 + $0x30] sm:$0xff]  ;;  %v111_v14 = vld [vmem:[%s390_s3 + $0x38] sm:$0xff] }
   0x4   :  { %v266_v8 = vpack.c.bf16 %v105_v5, %v104_v3  ;;  %v108_v10 = vld [vmem:[%s390_s3 + $0x20] sm:$0xff]  ;;  %v275_v15 = vpack.c.bf16 %v111_v14, %v110_v13  ;;  %v113_v17 = vld [vmem:[%s390_s3 + $0x48] sm:$0xff]  ;;  %v114_v19 = vld [vmem:[%s390_s3 + $0x50] sm:$0xff] }
   0x5   :  { %v272_v12 = vpack.c.bf16 %v109_v11, %v108_v10  ;;  %v112_v16 = vld [vmem:[%s390_s3 + $0x40] sm:$0xff]  ;;  %v115_v20 = vld [vmem:[%s390_s3 + $0x58] sm:$0xff]  ;;  %v117_v23 = vld [vmem:[%s390_s3 + $0x68] sm:$0xff] }
   0x6   :  { %267 = vmatpush3.bf16.msra.mxu1 %v266_v8  ;;  %v278_v18 = vpack.c.bf16 %v113_v17, %v112_v16  ;;  %v281_v21 = vpack.c.bf16 %v115_v20, %v114_v19  ;;  %v116_v22 = vld [vmem:[%s390_s3 + $0x60] sm:$0xff]  ;;  %v118_v25 = vld [vmem:[%s390_s3 + $0x70] sm:$0xff]  ;;  %v119_v26 = vld [vmem:[%s390_s3 + $0x78] sm:$0xff] }
   0x7   :  { %268 = vmatprep.subr.bf16.mxu1 %v294_v4  ;;  %v284_v24 = vpack.c.bf16 %v117_v23, %v116_v22  ;;  %v287_v27 = vpack.c.bf16 %v119_v26, %v118_v25  ;;  %v203_v28 = vld [vmem:[%s391_s2] ss:$0 sm:$0xff] }
   0x8   :  { %v205_v33 = vld [vmem:[%s392_s4] ss:$0 sm:$0xff] }
   0xa   :  { %270 = vmatpush3.bf16.msra.mxu1 %v269_v9 }
   0xb   :  { %271 = vmatprep.subr.bf16.mxu1 %v294_v4 }
   0xe   :  { %273 = vmatpush3.bf16.msra.mxu1 %v272_v12 }
   0xf   :  { %274 = vmatprep.subr.bf16.mxu1 %v294_v4 }
  0x12   :  { %276 = vmatpush3.bf16.msra.mxu1 %v275_v15 }
  0x13   :  { %277 = vmatprep.subr.bf16.mxu1 %v294_v4 }
  0x16   :  { %279 = vmatpush3.bf16.msra.mxu1 %v278_v18 }
  0x17   :  { %280 = vmatprep.subr.bf16.mxu1 %v294_v4 }
  0x1a   :  { %282 = vmatpush3.bf16.msra.mxu1 %v281_v21 }
  0x1b   :  { %283 = vmatprep.subr.bf16.mxu1 %v294_v4 }
  0x1e   :  { %285 = vmatpush3.bf16.msra.mxu1 %v284_v24 }
  0x1f   :  { %286 = vmatprep.subr.bf16.mxu1 %v294_v4 }
  0x22   :  { %288 = vmatpush3.bf16.msra.mxu1 %v287_v27 }
  0xd6   :  { %v99_v29 = vpop.f32.mrb[0].mxu0 }
  0xd7   :  { %v100_v30 = vadd.f32 %v203_v28, %v99_v29  ;;  %v229_v31 = vpop.f32.mrb[1].mxu0 }
  0xd9   :  { %v103_v32 = vmax.f32 %v100_v30, 0.0 }
  0xdb   :  { %263 = vmatmul.mubr.f32.vlgmr.msra.gmra.mrb[0].mxu1 %v103_v32 }
 0x1ae   :  { %v193_v34 = vpop.f32.mrb[0].mxu1 }
 0x1af   :  { %v194_v35 = vadd.f32 %v205_v33, %v193_v34  ;;  %v264_v36 = vpop.f32.mrb[1].mxu1 }
 0x1b1   :  { %198 = vst.msk [vmem:[%s393_s5] sm:$0xff] %vm197_vm2, %v194_v35 }

</bundles_post_ra>
